<compile_context>
chip_gen: v7x
topology: tpu7x:2x2x1
jax: 0.10.0
libtpu: 0.0.40
codegen_flags: <defaults>
</compile_context>

<pallas_src>
import functools

import jax
import jax.numpy as jnp
from jax import lax
from jax.experimental import pallas as pl
from jax.experimental.pallas import tpu as pltpu

LANE = 128


def _vmem_capacity_bytes():
    """Per-TensorCore VMEM capacity; falls back to 128 MiB (v5e/v6e) if the
    query is unavailable."""
    try:
        return int(pltpu.get_tpu_info().vmem_capacity_bytes)
    except Exception:
        return 128 << 20


# --------------------------------------------------------------------------
# Fused kernel: streamed sum/max reduction + shared-MLP + sigmoid epilogue.
# grid = (batch blocks, spatial blocks); spatial axis is the reduction axis.
# --------------------------------------------------------------------------
def _ca_fused_kernel(x_ref, w1_ref, w2_ref, out_ref, sum_acc, max_acc, *,
                     hw_true, t_hw, mask_last):
    # x_ref  : (TN, C, T_HW) streamed tile         w1_ref: (C, Ch) resident
    # w2_ref : (Ch, C) resident                    out_ref: (TN, C)
    # sum_acc: (TN, C) f32    max_acc: (TN, C) x.dtype
    k = pl.program_id(1)
    nk = pl.num_programs(1)

    @pl.when(k == 0)
    def _init():
        sum_acc[...] = jnp.zeros_like(sum_acc)
        max_acc[...] = jnp.full_like(max_acc, -jnp.inf)

    x = x_ref[...]                                      # input dtype

    def _update(x_sum, x_max):
        sum_acc[...] += jnp.sum(x_sum.astype(jnp.float32), axis=-1)
        max_acc[...] = jnp.maximum(max_acc[...], jnp.max(x_max, axis=-1))

    if mask_last:
        # Only the final spatial tile contains out-of-bounds lanes; keep every
        # other step mask-free (pure DMA + reduce).
        @pl.when(k < nk - 1)
        def _full_tile():
            _update(x, x)

        @pl.when(k == nk - 1)
        def _tail_tile():
            lane = lax.broadcasted_iota(jnp.int32, (1, 1, t_hw), 2)
            valid = (k * t_hw + lane) < hw_true
            zero = jnp.asarray(0, dtype=x.dtype)
            neg_inf = jnp.asarray(-jnp.inf, dtype=x.dtype)
            _update(jnp.where(valid, x, zero), jnp.where(valid, x, neg_inf))
    else:
        _update(x, x)

    @pl.when(k == nk - 1)
    def _epilogue():
        tn = sum_acc.shape[0]
        avg = sum_acc[...] * (1.0 / hw_true)            # (TN, C) f32
        mx = max_acc[...].astype(jnp.float32)           # (TN, C) f32
        both = jnp.concatenate([avg, mx], axis=0)       # (2*TN, C)
        w1 = w1_ref[...].astype(jnp.float32)            # (C, Ch)
        w2 = w2_ref[...].astype(jnp.float32)            # (Ch, C)
        h = jnp.maximum(jnp.dot(both, w1, preferred_element_type=jnp.float32), 0.0)
        y2 = jnp.dot(h, w2, preferred_element_type=jnp.float32)
        y = y2[:tn] + y2[tn:]
        out_ref[...] = jax.nn.sigmoid(y).astype(out_ref.dtype)


# --------------------------------------------------------------------------
# Split kernel (v7x small-batch path): partial sum/max per spatial half so
# both TensorCores stream HBM; combine + MLP + sigmoid done in the wrapper.
# grid = (split, batch blocks, local spatial blocks).
# --------------------------------------------------------------------------
def _ca_partial_kernel(x_ref, sum_ref, max_ref, sum_acc, max_acc, *,
                       hw_true, t_hw, nk_local, mask_tail):
    s = pl.program_id(0)
    k = pl.program_id(2)
    kg = s * nk_local + k                               # global spatial block

    @pl.when(k == 0)
    def _init():
        sum_acc[...] = jnp.zeros_like(sum_acc)
        max_acc[...] = jnp.full_like(max_acc, -jnp.inf)

    x = x_ref[...]

    def _update(x_sum, x_max):
        sum_acc[...] += jnp.sum(x_sum.astype(jnp.float32), axis=-1)
        max_acc[...] = jnp.maximum(max_acc[...], jnp.max(x_max, axis=-1))

    if mask_tail:
        is_tail = (kg + 1) * t_hw > hw_true             # partial / fully-OOB tile

        @pl.when(jnp.logical_not(is_tail))
        def _full_tile():
            _update(x, x)

        @pl.when(is_tail)
        def _tail_tile():
            lane = lax.broadcasted_iota(jnp.int32, (1, 1, t_hw), 2)
            valid = (kg * t_hw + lane) < hw_true
            zero = jnp.asarray(0, dtype=x.dtype)
            neg_inf = jnp.asarray(-jnp.inf, dtype=x.dtype)
            _update(jnp.where(valid, x, zero), jnp.where(valid, x, neg_inf))
    else:
        _update(x, x)

    @pl.when(k == nk_local - 1)
    def _write():
        sum_ref[...] = sum_acc[...].reshape((1,) + sum_acc.shape)
        max_ref[...] = max_acc[...].astype(max_ref.dtype).reshape((1,) + max_acc.shape)


def channel_attention(x, w1, w2, *, t_hw=None, split_spatial=None):
    """ChannelAttention (CBAM) forward.

    x:  (N, C, H, W); w1: (Ch, C, 1, 1); w2: (C, Ch, 1, 1) (1x1 convs, no bias).
    Returns the sigmoid channel-attention map of shape (N, C, 1, 1).
    """
    N, C, H, W = x.shape
    Ch = w1.shape[0]
    hw = H * W

    x_flat = x.reshape(N, C, hw)          # merges contiguous minor dims: free
    w1t = w1[:, :, 0, 0].T                # (C, Ch)
    w2t = w2[:, :, 0, 0].T                # (Ch, C)

    # ---- batch tiling (leading dim: no (8,128) constraint) ----
    if N <= 8:
        tn = N
    elif N < 16:
        tn = 8
    elif N < 32:
        tn = 16
    else:
        tn = 32
    grid_n = pl.cdiv(N, tn)

    # ---- generation-aware VMEM budget / tile sizing ----
    vmem_cap = _vmem_capacity_bytes()
    small_vmem = vmem_cap <= (64 << 20)   # v7x-like: 64 MiB per TC, 2 TCs
    per_buf_budget = (14 << 20) if small_vmem else (20 << 20)
    vmem_ceiling = (52 << 20) if small_vmem else (100 << 20)

    itemsize = jnp.dtype(x.dtype).itemsize
    max_lanes = max(LANE, (per_buf_budget // (tn * C * itemsize)) // LANE * LANE)
    if t_hw is None:
        t_hw = int(min(pl.cdiv(hw, LANE) * LANE, max_lanes))
    else:
        # Validate a caller-supplied t_hw: lane-dense and within the VMEM budget.
        t_hw = int(max(LANE, min(pl.cdiv(t_hw, LANE) * LANE, max_lanes)))
    grid_k = pl.cdiv(hw, t_hw)

    x_tile_bytes = tn * C * t_hw * itemsize
    other_bytes = 2 * (C * Ch + Ch * C) * 4 + 8 * tn * C * 4
    vmem_limit = int(min(max(2 * x_tile_bytes + other_bytes + (4 << 20),
                             32 << 20), vmem_ceiling))

    # ---- v7x: use both TensorCores when the batch axis alone cannot ----
    if split_spatial is None:
        split_spatial = small_vmem and grid_n == 1 and grid_k >= 2
    split_spatial = bool(split_spatial) and grid_k >= 2

    if not split_spatial:
        mask_last = (hw % t_hw) != 0
        kernel = functools.partial(_ca_fused_kernel, hw_true=hw, t_hw=t_hw,
                                   mask_last=mask_last)
        out = pl.pallas_call(
            kernel,
            out_shape=jax.ShapeDtypeStruct((N, C), x.dtype),
            grid_spec=pltpu.PrefetchScalarGridSpec(
                num_scalar_prefetch=0,
                grid=(grid_n, grid_k),
                in_specs=[
                    pl.BlockSpec((tn, C, t_hw), lambda n, k: (n, 0, k)),  # streamed x
                    pl.BlockSpec((C, Ch), lambda n, k: (0, 0)),           # resident w1
                    pl.BlockSpec((Ch, C), lambda n, k: (0, 0)),           # resident w2
                ],
                out_specs=pl.BlockSpec((tn, C), lambda n, k: (n, 0)),
                scratch_shapes=[pltpu.VMEM((tn, C), jnp.float32),         # running sum
                                pltpu.VMEM((tn, C), x.dtype)],            # running max
            ),
            compiler_params=pltpu.CompilerParams(
                dimension_semantics=("parallel", "arbitrary"),
                vmem_limit_bytes=vmem_limit,
            ),
        )(x_flat, w1t, w2t)
        return out.reshape(N, C, 1, 1)

    # ---------------- split (two-TensorCore) path ----------------
    n_split = 2
    nk_local = pl.cdiv(grid_k, n_split)
    total_blocks = n_split * nk_local
    mask_tail = (total_blocks * t_hw) != hw
    last_block = grid_k - 1                     # clamp DMA for fully-OOB tiles

    kernel = functools.partial(_ca_partial_kernel, hw_true=hw, t_hw=t_hw,
                               nk_local=nk_local, mask_tail=mask_tail)
    sum_p, max_p = pl.pallas_call(
        kernel,
        out_shape=(jax.ShapeDtypeStruct((n_split, N, C), jnp.float32),
                   jax.ShapeDtypeStruct((n_split, N, C), x.dtype)),
        grid_spec=pltpu.PrefetchScalarGridSpec(
            num_scalar_prefetch=0,
            grid=(n_split, grid_n, nk_local),
            in_specs=[
                pl.BlockSpec(
                    (tn, C, t_hw),
                    lambda s, n, k, _nk=nk_local, _kmax=last_block:
                        (n, 0, jnp.minimum(s * _nk + k, _kmax))),
            ],
            out_specs=[
                pl.BlockSpec((1, tn, C), lambda s, n, k: (s, n, 0)),
                pl.BlockSpec((1, tn, C), lambda s, n, k: (s, n, 0)),
            ],
            scratch_shapes=[pltpu.VMEM((tn, C), jnp.float32),
                            pltpu.VMEM((tn, C), x.dtype)],
        ),
        compiler_params=pltpu.CompilerParams(
            dimension_semantics=("parallel", "parallel", "arbitrary"),
            vmem_limit_bytes=vmem_limit,
        ),
    )(x_flat)

    # Tiny combine + shared MLP + sigmoid: O(N*C*Ch), negligible next to the
    # HBM-bound reduction, done in plain JAX.
    avg = jnp.sum(sum_p, axis=0) * (1.0 / hw)               # (N, C) f32
    mx = jnp.max(max_p, axis=0).astype(jnp.float32)         # (N, C) f32
    w1f = w1t.astype(jnp.float32)
    w2f = w2t.astype(jnp.float32)

    def _mlp(v):
        return jnp.maximum(v @ w1f, 0.0) @ w2f

    y = jax.nn.sigmoid(_mlp(avg) + _mlp(mx)).astype(x.dtype)
    return y.reshape(N, C, 1, 1)


def reference(x, w1, w2):
    # Pure-JAX reference mirroring the PyTorch forward.
    avg = jnp.mean(x, axis=(2, 3))                       # (N, C)
    mx = jnp.max(x, axis=(2, 3))                         # (N, C)
    w1m = w1[:, :, 0, 0]                                 # (Ch, C)
    w2m = w2[:, :, 0, 0]                                 # (C, Ch)

    def mlp(v):
        return jnp.maximum(v @ w1m.T, 0.0) @ w2m.T

    return jax.nn.sigmoid(mlp(avg) + mlp(mx))[:, :, None, None]


if __name__ == "__main__":
    key = jax.random.PRNGKey(0)

    def _check(name, n, c, h, w, ratio, t_hw, split, key):
        ch = max(1, c // ratio)
        kx, k1, k2, key = jax.random.split(key, 4)
        x = jax.random.normal(kx, (n, c, h, w), dtype=jnp.float32)
        w1 = jax.random.normal(k1, (ch, c, 1, 1), dtype=jnp.float32) * 0.1
        w2 = jax.random.normal(k2, (c, ch, 1, 1), dtype=jnp.float32) * 0.1
        out = jax.block_until_ready(
            channel_attention(x, w1, w2, t_hw=t_hw, split_spatial=split))
        ref = reference(x, w1, w2)
        assert out.shape == (n, c, 1, 1), (name, out.shape)
        err = float(jnp.max(jnp.abs(out - ref)))
        assert jnp.allclose(out, ref, atol=1e-5, rtol=1e-5), (name, err)
        return key

    # 1) Fused single-kernel path: evenly divided spatial tiles, no masking,
    #    single batch block (in_planes=64, ratio=16 -> hidden=4).
    key = _check("fused_even", 2, 64, 16, 16, 16, 128, False, key)

    # 2) Fused path with a masked spatial remainder tile (15*15=225) and a
    #    partial last batch block (N=10, tn=8) -- no wrapper padding anywhere.
    key = _check("fused_masked", 10, 64, 15, 15, 16, 128, None, key)

    # 3) Forced two-TensorCore split path: odd tile count (17*17=289, 3 tiles)
    #    exercises the clamped fully-out-of-bounds tile and the masked tail.
    key = _check("split_masked", 4, 64, 17, 17, 16, 128, True, key)

    print("KERNEL_OK")
</pallas_src>

<mosaic_0001>
module attributes {stable_mosaic.version = 11 : i64} {
  func.func @_ca_fused_kernel(%arg0: i32, %arg1: i32, %arg2: memref<2x64x128xf32, #tpu.memory_space<vmem>>, %arg3: memref<64x4xf32, #tpu.memory_space<vmem>>, %arg4: memref<4x64xf32, #tpu.memory_space<vmem>>, %arg5: memref<2x64xf32, #tpu.memory_space<vmem>>, %arg6: memref<2x64xf32, #tpu.memory_space<vmem>>, %arg7: memref<2x64xf32, #tpu.memory_space<vmem>>) attributes {dimension_semantics = [#tpu.dimension_semantics<parallel>, #tpu.dimension_semantics<arbitrary>], iteration_bounds = array<i64: 1, 2>, scalar_prefetch = 0 : i64, scratch_operands = 2 : i64, tpu.core_type = #tpu.core_type<tc>, window_params = [{transform_indices = @transform_0, window_bounds = array<i64: 2, 64, 128>}, {pipeline_mode = #tpu.pipeline_mode<synchronous>, transform_indices = @transform_1, window_bounds = array<i64: 64, 4>}, {pipeline_mode = #tpu.pipeline_mode<synchronous>, transform_indices = @transform_2, window_bounds = array<i64: 4, 64>}, {transform_indices = @transform_3, window_bounds = array<i64: 2, 64>}]} {
    %c0_i32 = arith.constant 0 : i32
    %0 = arith.cmpi eq, %arg1, %c0_i32 : i32
    %1 = arith.extui %0 : i1 to i32
    %c0_i32_0 = arith.constant 0 : i32
    %2 = arith.cmpi ne, %1, %c0_i32_0 : i32
    scf.if %2 {
      %cst_13 = arith.constant 0.000000e+00 : f32
      %15 = vector.broadcast %cst_13 : f32 to vector<2x64xf32>
      %c0_14 = arith.constant 0 : index
      %c0_15 = arith.constant 0 : index
      %16 = vector.load %arg6[%c0_14, %c0_15] : memref<2x64xf32, #tpu.memory_space<vmem>>, vector<2x64xf32>
      tpu.vector_store %arg6[%c0_14, %c0_15], %15 {strides = array<i32>} : memref<2x64xf32, #tpu.memory_space<vmem>>, vector<2x64xf32>,
      %cst_16 = arith.constant 0xFF800000 : f32
      %17 = vector.broadcast %cst_16 : f32 to vector<2x64xf32>
      %c0_17 = arith.constant 0 : index
      %c0_18 = arith.constant 0 : index
      %18 = vector.load %arg7[%c0_17, %c0_18] : memref<2x64xf32, #tpu.memory_space<vmem>>, vector<2x64xf32>
      tpu.vector_store %arg7[%c0_17, %c0_18], %17 {strides = array<i32>} : memref<2x64xf32, #tpu.memory_space<vmem>>, vector<2x64xf32>,
    } else {
    }
    %c0 = arith.constant 0 : index
    %c0_1 = arith.constant 0 : index
    %c0_2 = arith.constant 0 : index
    %3 = vector.load %arg2[%c0, %c0_1, %c0_2] : memref<2x64x128xf32, #tpu.memory_space<vmem>>, vector<2x64x128xf32>
    %c0_3 = arith.constant 0 : index
    %c0_4 = arith.constant 0 : index
    %4 = vector.load %arg6[%c0_3, %c0_4] : memref<2x64xf32, #tpu.memory_space<vmem>>, vector<2x64xf32>
    %cst = arith.constant dense<0.000000e+00> : vector<2x64xf32>
    %5 = vector.multi_reduction <add>, %3, %cst [2] : vector<2x64x128xf32> to vector<2x64xf32>
    %6 = arith.addf %4, %5 : vector<2x64xf32>
    %c0_5 = arith.constant 0 : index
    %c0_6 = arith.constant 0 : index
    %7 = vector.load %arg6[%c0_5, %c0_6] : memref<2x64xf32, #tpu.memory_space<vmem>>, vector<2x64xf32>
    tpu.vector_store %arg6[%c0_5, %c0_6], %6 {strides = array<i32>} : memref<2x64xf32, #tpu.memory_space<vmem>>, vector<2x64xf32>,
    %c0_7 = arith.constant 0 : index
    %c0_8 = arith.constant 0 : index
    %8 = vector.load %arg7[%c0_7, %c0_8] : memref<2x64xf32, #tpu.memory_space<vmem>>, vector<2x64xf32>
    %cst_9 = arith.constant dense<0xFF800000> : vector<2x64xf32>
    %9 = vector.multi_reduction <maximumf>, %3, %cst_9 [2] : vector<2x64x128xf32> to vector<2x64xf32>
    %10 = arith.maximumf %8, %9 : vector<2x64xf32>
    %c0_10 = arith.constant 0 : index
    %c0_11 = arith.constant 0 : index
    %11 = vector.load %arg7[%c0_10, %c0_11] : memref<2x64xf32, #tpu.memory_space<vmem>>, vector<2x64xf32>
    tpu.vector_store %arg7[%c0_10, %c0_11], %10 {strides = array<i32>} : memref<2x64xf32, #tpu.memory_space<vmem>>, vector<2x64xf32>,
    %c1_i32 = arith.constant 1 : i32
    %12 = arith.cmpi eq, %arg1, %c1_i32 : i32
    %13 = arith.extui %12 : i1 to i32
    %c0_i32_12 = arith.constant 0 : i32
    %14 = arith.cmpi ne, %13, %c0_i32_12 : i32
    scf.if %14 {
      %c0_13 = arith.constant 0 : index
      %c0_14 = arith.constant 0 : index
      %15 = vector.load %arg6[%c0_13, %c0_14] : memref<2x64xf32, #tpu.memory_space<vmem>>, vector<2x64xf32>
      %cst_15 = arith.constant 3.906250e-03 : f32
      %16 = vector.broadcast %cst_15 : f32 to vector<2x64xf32>
      %17 = arith.mulf %15, %16 : vector<2x64xf32>
      %c0_16 = arith.constant 0 : index
      %c0_17 = arith.constant 0 : index
      %18 = vector.load %arg7[%c0_16, %c0_17] : memref<2x64xf32, #tpu.memory_space<vmem>>, vector<2x64xf32>
      %19 = tpu.concatenate %17, %18 in 0 : vector<2x64xf32>, vector<2x64xf32> -> vector<4x64xf32>
      %c0_18 = arith.constant 0 : index
      %c0_19 = arith.constant 0 : index
      %20 = vector.load %arg3[%c0_18, %c0_19] : memref<64x4xf32, #tpu.memory_space<vmem>>, vector<64x4xf32>
      %c0_20 = arith.constant 0 : index
      %c0_21 = arith.constant 0 : index
      %21 = vector.load %arg4[%c0_20, %c0_21] : memref<4x64xf32, #tpu.memory_space<vmem>>, vector<4x64xf32>
      %cst_22 = arith.constant dense<0.000000e+00> : vector<4x4xf32>
      %22 = tpu.matmul %19, %20, %cst_22 {dimension_numbers = #tpu.dot_dimension_numbers<[1], [0], [0], [1], [0, 0, 1, 1], [], []>} : vector<4x64xf32>, vector<64x4xf32>, vector<4x4xf32> -> vector<4x4xf32>
      %cst_23 = arith.constant 0.000000e+00 : f32
      %23 = vector.broadcast %cst_23 : f32 to vector<4x4xf32>
      %24 = arith.maximumf %22, %23 : vector<4x4xf32>
      %cst_24 = arith.constant dense<0.000000e+00> : vector<4x64xf32>
      %25 = tpu.matmul %24, %21, %cst_24 {dimension_numbers = #tpu.dot_dimension_numbers<[1], [0], [0], [1], [0, 0, 1, 1], [], []>} : vector<4x4xf32>, vector<4x64xf32>, vector<4x64xf32> -> vector<4x64xf32>
      %26 = vector.extract_strided_slice %25 {offsets = [0, 0], sizes = [2, 64], strides = [1, 1]} : vector<4x64xf32> to vector<2x64xf32>
      %27 = vector.extract_strided_slice %25 {offsets = [2, 0], sizes = [2, 64], strides = [1, 1]} : vector<4x64xf32> to vector<2x64xf32>
      %28 = arith.addf %26, %27 : vector<2x64xf32>
      %29 = arith.negf %28 : vector<2x64xf32>
      %30 = math.exp %29 : vector<2x64xf32>
      %cst_25 = arith.constant 1.000000e+00 : f32
      %31 = vector.broadcast %cst_25 : f32 to vector<2x64xf32>
      %32 = arith.addf %31, %30 : vector<2x64xf32>
      %33 = arith.divf %31, %32 : vector<2x64xf32>
      %c0_26 = arith.constant 0 : index
      %c0_27 = arith.constant 0 : index
      %34 = vector.load %arg5[%c0_26, %c0_27] : memref<2x64xf32, #tpu.memory_space<vmem>>, vector<2x64xf32>
      tpu.vector_store %arg5[%c0_26, %c0_27], %33 {strides = array<i32>} : memref<2x64xf32, #tpu.memory_space<vmem>>, vector<2x64xf32>,
    } else {
    }
    return
  }
  func.func @transform_0(%arg0: i32, %arg1: i32) -> (i32, i32, i32) {
    %c0_i32 = arith.constant 0 : i32
    %c0_i32_0 = arith.constant 0 : i32
    return %arg0, %c0_i32, %arg1 : i32, i32, i32
  }
  func.func @transform_1(%arg0: i32, %arg1: i32) -> (i32, i32) {
    %c0_i32 = arith.constant 0 : i32
    %c0_i32_0 = arith.constant 0 : i32
    %c0_i32_1 = arith.constant 0 : i32
    return %c0_i32, %c0_i32_0 : i32, i32
  }
  func.func @transform_2(%arg0: i32, %arg1: i32) -> (i32, i32) {
    %c0_i32 = arith.constant 0 : i32
    %c0_i32_0 = arith.constant 0 : i32
    %c0_i32_1 = arith.constant 0 : i32
    return %c0_i32, %c0_i32_0 : i32, i32
  }
  func.func @transform_3(%arg0: i32, %arg1: i32) -> (i32, i32) {
    %c0_i32 = arith.constant 0 : i32
    %c0_i32_0 = arith.constant 0 : i32
    return %arg0, %c0_i32 : i32, i32
  }
}

</mosaic_0001>

<bundles_post_ra>
// kernel: tpu_custom_call.1
= control target key start
LH: loop header
LB: loop body
LE: loop exit
PB: predicated region body
PF: predicated region fallthrough
CT: control target
= control target key end

     0   :  { %8 = vsyncpa [#allocation5], 0  ;;  %s1372_s0 = inlined_call_operand.hbm [shape: f32[2,64,256], index: 0, kind: input, shape index: {}]   ;;  %s1373_s1 = inlined_call_operand.vmem [shape: f32[64,4], index: 1, kind: input, shape index: {}]   ;;  %s1374_s2 = inlined_call_operand.vmem [shape: f32[4,64], index: 2, kind: input, shape index: {}]   ;;  %s1375_s3 = inlined_call_operand.hbm [shape: f32[2,64], index: 3, kind: output, shape index: {}]  }
   0x1   :  { %10 = vsyncpa [#allocation5 + $0x1], 0 }
   0x2   :  { %11 = vsyncpa [#allocation6], 0  ;;  %s1039_s12 = smov 0   ;;  %s1041_s13 = smov 0  }
   0x3   :  { %s1043_s14 = smov 0   ;;  %s1045_s15 = smov 0  }
   0x4   :  { %s1047_s16 = smov 0   ;;  %s1049_s17 = smov 0  }
   0x5 LB: > { %s759_s18 = sadd.s32 4294967295, %s1007_s17   ;;  %s26_s19 = sadd.s32 1, %s1003_s16  ;;  %s1007_s17 = sphi %s1049_s17, %s17_s17   ;;  %s1003_s16 = sphi %s1047_s16, %s1385_s16   ;;  %s999_s15 = sphi %s1045_s15, %s1384_s15   ;;  %s995_s14 = sphi %s1043_s14, %s1383_s14   ;;  %s991_s13 = sphi %s1041_s13, %s1382_s13   ;;  %s987_s12 = sphi %s1039_s12, %s1381_s12  }
   0x6   : > { %p27_p0 = scmp.ge.s32.totalorder %s26_s19, 2  ;;  %s38_s20 = sadd.s32 1, %s995_s14 }
   0x7   : > { %p45_p1 = scmp.ne.s32.totalorder %s995_s14, %s991_s13  ;;  %p46_p2 = scmp.eq.s32.totalorder %s1007_s17, 0 }
   0x8   : > { %s1387_s19 = smov (%p27_p0, %s26_s19), 0  ;;  %p51_p4 = scmp.ne.s32.totalorder %s991_s13, %s987_s12 }
   0x9   : > { %p1075_p3 = por %p46_p2, %p45_p1  ;;  %s34_s22 = ssub.s32 %s1003_s16, %s1387_s19 }
   0xa   : > { %p52_p5 = scmp.eq.s32.totalorder %s759_s18, 0  ;;  %p36_p6 = scmp.eq.s32.totalorder %s34_s22, 0 }
   0xb   : > { %p833_p8 = scmp.lt.s32.totalorder %s1007_s17, 2  ;;  %s149_s25 = sand.u32 1, %s995_s14  }
   0xc   : > { %p1084_p7 = por %p52_p5, %p51_p4  ;;  %s763_s26 = sshll.u32 %s1003_s16, 7 }
   0xd   : > { %s1090_s24 = scalar_select %p36_p6, %s995_s14, %s38_s20  }
   0xe   : > { %s762_s27 = sshll.u32 %s149_s25, 7  ;;  %s1097_s30 = scalar_lea.hbm %s1372_s0, %s763_s26 }
   0xf   : > { %s153_s4 = scalar_lea.vmem [#allocation4], %s762_s27  ;;  %p1101_p9 = pnand %p833_p8, %p1075_p3 }
  0x10   : > { %s162_s5 = sshll.u32 %s153_s4, 4  ;;  %s1108_s7 = scalar_lea.sflag [#allocation5], %s149_s25  ;;  %s1105_s5 = int_to_ptr.vmem [resolvable:$true] %s162_s5 }
  0x11   : > { %s897_s8 = scalar_lea.hbm %s1097_s30, 2048  ;;  %p899_p12 = pneg %p1101_p9 }
  0x12   : > { %p898_p11 = scmp.ne.s32.totalorder %s1097_s30, %s897_s8  ;;  %s902_s11 = scalar_lea.hbm %s1372_s0, 4096 }
  0x13   : > { %p903_p1 = scmp.lt.u32.totalorder %s1097_s30, %s1372_s0  ;;  %p904_p2 = scmp.lt.u32.totalorder %s902_s11, %s897_s8 }
  0x14   : > { %p900_p13 = pnand %p899_p12, %p898_p11  ;;  %p906_p4 = scmp.lt.u32.totalorder %s897_s8, %s1097_s30 }
  0x15   : > { %p905_p3 = por %p904_p2, %p903_p1 }
  0x16   : > { %p901_p0 = pneg %p900_p13 }
  0x17   : > { %p907_p5 = por %p906_p4, %p905_p3 }
  0x19   : > { %p908_p6 = pnand %p907_p5, %p901_p0 }
  0x1b   : > { %911 = shalt.err (!%p908_p6)
}
  0x1c   : > { %s912_s21 = scalar_lea.vmem %s1105_s5, 2048  ;;  %s1009_s22 = smov [#allocation4]  }
  0x1d   : > { %p913_p8 = scmp.ne.s32.totalorder %s1105_s5, %s912_s21  ;;  %s917_s25 = sshll.u32 %s1009_s22, 4  ;;  %s918_s25 = int_to_ptr.vmem [resolvable:$false] %s917_s25 }
  0x1e   : > { %s919_s26 = scalar_lea.vmem %s918_s25, 4096  ;;  %p920_p10 = scmp.lt.s32.totalorder %s1105_s5, %s918_s25 }
  0x1f   : > { %p915_p11 = pnand %p913_p8, %p899_p12  ;;  %p921_p1 = scmp.lt.s32.totalorder %s919_s26, %s912_s21 }
  0x21   : > { %p916_p13 = pneg %p915_p11  ;;  %p922_p2 = por %p921_p1, %p920_p10 }
  0x23   : > { %p923_p3 = pnand %p922_p2, %p916_p13 }
  0x25   : > { %926 = shalt.err (!%p923_p3)
}
  0x26   : > { %s1010_s27 = smov 256   ;;  %s1011_s28 = smov 128  }
  0x27   : > { %s1012_s29 = smov 8   ;;  %p170_p12 = scmp.lt.s32.totalorder %s1007_s17, 3 }
  0x28   : > { %832 = dma.hbm_to_vmem [thread:$0]  (!%p1101_p9), %s1097_s30, 2048, %s1105_s5, %s1108_s7, %s1010_s27, %s1011_s28, %s1012_s29  }
  0x29   : > { %p1379_p0 = scmp.ge.s32.totalorder %s1007_s17, 1 }
  0x2b   : > { %p171_p4 = pnand %p1379_p0, %p170_p12 }
  0x2c   : > { %s176_s4 = sand.u32 (!%p171_p4), 1, %s991_s13  }
  0x2d   : > { %174 = sbr.rel (%p171_p4) target bundleno = 766 (0x2fe), region = 32  ;;  %s765_s8 = sshll.u32 (!%p171_p4), %s176_s4, 7 }
  0x2e   : > { %s177_s9 = scalar_lea.sflag (!%p171_p4), [#allocation5], %s176_s4  ;;  %s1140_s10 = scalar_lea.vmem (!%p171_p4), [#allocation4], %s765_s8 }
  0x34   : > { %978 = dma.done.wait (%p1084_p7), %s177_s9, 2048  }
  0x35   : > { %980 = vsyncadd (%p1084_p7), %s177_s9, 4294965248  ;;  %p766_p10 = scmp.ne.s32.totalorder %s999_s15, 0 }
  0x36   : > { %vm203_vm0 = vcmask (!%p766_p10), 517120   ;;  %v1013_v0 = vmov (!%p766_p10), 0.0   ;;  %v1014_v1 = vmov (!%p766_p10), -inf  }
  0x37   : > { %202 = sbr.rel (%p766_p10) target bundleno = 62 (0x3e), region = 40  ;;  %204 = vst.msk [vmem:[#allocation2] sm:$0x3] (!%p766_p10), %vm203_vm0, %v1013_v0  ;;  %205 = vst.msk [vmem:[#allocation3] sm:$0x3] (!%p766_p10), %vm203_vm0, %v1014_v1 }
  0x3e PF: > { %v214_v2 = vld [vmem:[%s1140_s10 + $0x40] sm:$0xff]  ;;  %v215_v4 = vld [vmem:[%s1140_s10 + $0x48] sm:$0xff]  ;;  %v216_v6 = vld [vmem:[%s1140_s10 + $0x50] sm:$0xff]  ;;  %v271_v34 = vlaneseq  ;;  %vm282_vm1 = vcmask 130112   ;;  %vm289_vm2 = vcmask 195712   ;;  %vm296_vm3 = vcmask 261312  }
  0x3f   : > { %v206_v3 = vld [vmem:[%s1140_s10] sm:$0xff]  ;;  %239 = vadd.xlane.f32.xlu1 %v214_v2  ;;  %v207_v5 = vld [vmem:[%s1140_s10 + $0x8] sm:$0xff]  ;;  %v208_v7 = vld [vmem:[%s1140_s10 + $0x10] sm:$0xff]  ;;  %vm303_vm4 = vcmask 326912   ;;  %vm310_vm5 = vcmask 392512   ;;  %vm317_vm6 = vcmask 458112  }
  0x40   : > { %223 = vadd.xlane.f32.xlu0 %v206_v3  ;;  %v217_v8 = vld [vmem:[%s1140_s10 + $0x58] sm:$0xff]  ;;  %v218_v10 = vld [vmem:[%s1140_s10 + $0x60] sm:$0xff]  ;;  %v219_v12 = vld [vmem:[%s1140_s10 + $0x68] sm:$0xff]  ;;  %v272_v37 = vand.u32 127, %v271_v34  ;;  %v274_v41 = vshrl.u32 %v271_v34, 7  ;;  %vm324_vm7 = vcmask 523712  }
  0x41   : > { %v209_v9 = vld [vmem:[%s1140_s10 + $0x18] sm:$0xff]  ;;  %v210_v11 = vld [vmem:[%s1140_s10 + $0x20] sm:$0xff]  ;;  %v211_v13 = vld [vmem:[%s1140_s10 + $0x28] sm:$0xff]  ;;  %vm365_vm8 = vcmask 1041409   ;;  %vm369_vm9 = vcmask 517120   ;;  %p767_p7 = scmp.ne.s32.totalorder %s999_s15, 1 }
  0x42   : > { %v220_v14 = vld [vmem:[%s1140_s10 + $0x70] sm:$0xff]  ;;  %v221_v16 = vld [vmem:[%s1140_s10 + $0x78] sm:$0xff]  ;;  %v277_v40 = vadd.s32 4294967288, %v272_v37  ;;  %v284_v42 = vadd.s32 4294967280, %v272_v37  ;;  %v291_v45 = vadd.s32 4294967272, %v272_v37  ;;  %v298_v46 = vadd.s32 4294967264, %v272_v37 }
  0x43   : > { %241 = vadd.xlane.f32.xlu1 %v215_v4  ;;  %v212_v15 = vld [vmem:[%s1140_s10 + $0x30] sm:$0xff]  ;;  %v213_v17 = vld [vmem:[%s1140_s10 + $0x38] sm:$0xff]  ;;  %v305_v48 = vadd.s32 4294967256, %v272_v37  ;;  %v312_v49 = vadd.s32 4294967248, %v272_v37  ;;  %v319_v50 = vadd.s32 4294967240, %v272_v37  ;;  %v275_v51 = vsub.s32 %v272_v37, %v274_v41 }
  0x44   : > { %225 = vadd.xlane.f32.xlu0 %v207_v5  ;;  %v280_v47 = vsub.s32 %v277_v40, %v274_v41  ;;  %v287_v52 = vsub.s32 %v284_v42, %v274_v41  ;;  %v1211_v55 = vsub.s32 %v291_v45, %v274_v41  ;;  %v1213_v56 = vsub.s32 %v298_v46, %v274_v41 }
  0x45   : > { %v1216_v58 = vsub.s32 %v305_v48, %v274_v41  ;;  %v1218_v59 = vsub.s32 %v312_v49, %v274_v41  ;;  %v1223_v63 = vsub.s32 %v319_v50, %v274_v41  ;;  %v222_v49 = vld [vmem:[#allocation2] sm:$0x3]  ;;  %vm1016_vm10 = vmmov (!%p767_p7), 0  }
  0x46   : > { %vm512_vm11 = vcmask (!%p767_p7), 1041408   ;;  %vm523_vm12 = vcmask (!%p767_p7), 523264   ;;  %vm602_vm13 = vcmask (!%p767_p7), 1043456   ;;  %vm598_vm14 = vcmask (!%p767_p7), 31744  }
  0x47   : > { %374 = vmax.xlane.f32.xlu1 %v207_v5 }
  0x48   : > { %372 = vmax.xlane.f32.xlu0 %v206_v3 }
  0x4b   : > { %390 = vmax.xlane.f32.xlu1 %v215_v4 }
  0x4c   : > { %388 = vmax.xlane.f32.xlu0 %v214_v2 }
  0x4f   : > { %243 = vadd.xlane.f32.xlu1 %v216_v6 }
  0x50   : > { %227 = vadd.xlane.f32.xlu0 %v208_v7 }
  0x53   : > { %392 = vmax.xlane.f32.xlu1 %v216_v6 }
  0x54   : > { %376 = vmax.xlane.f32.xlu0 %v208_v7 }
  0x57   : > { %245 = vadd.xlane.f32.xlu1 %v217_v8 }
  0x58   : > { %229 = vadd.xlane.f32.xlu0 %v209_v9 }
  0x5b   : > { %394 = vmax.xlane.f32.xlu1 %v217_v8 }
  0x5c   : > { %378 = vmax.xlane.f32.xlu0 %v209_v9 }
  0x5f   : > { %247 = vadd.xlane.f32.xlu1 %v218_v10 }
  0x60   : > { %231 = vadd.xlane.f32.xlu0 %v210_v11 }
  0x63   : > { %396 = vmax.xlane.f32.xlu1 %v218_v10 }
  0x64   : > { %380 = vmax.xlane.f32.xlu0 %v210_v11 }
  0x67   : > { %249 = vadd.xlane.f32.xlu1 %v219_v12 }
  0x68   : > { %233 = vadd.xlane.f32.xlu0 %v211_v13 }
  0x6b   : > { %398 = vmax.xlane.f32.xlu1 %v219_v12 }
  0x6c   : > { %382 = vmax.xlane.f32.xlu0 %v211_v13 }
  0x6f   : > { %251 = vadd.xlane.f32.xlu1 %v220_v14 }
  0x70   : > { %235 = vadd.xlane.f32.xlu0 %v212_v15 }
  0x73   : > { %400 = vmax.xlane.f32.xlu1 %v220_v14 }
  0x74   : > { %384 = vmax.xlane.f32.xlu0 %v212_v15 }
  0x77   : > { %253 = vadd.xlane.f32.xlu1 %v221_v16 }
  0x78   : > { %237 = vadd.xlane.f32.xlu0 %v213_v17 }
  0x7b   : > { %402 = vmax.xlane.f32.xlu1 %v221_v16 }
  0x7c   : > { %386 = vmax.xlane.f32.xlu0 %v213_v17 }
  0xcc   : > { %v1163_v18 = vpop.xlane.xlu1 %239 }
  0xcd   : > { %v1165_v19 = vpop.xlane.xlu0 %223  ;;  %v329_v0 = vrot.slane %v1163_v18, %v275_v51 }
  0xce   : > { %v276_v6 = vrot.slane %v1165_v19, %v275_v51 }
  0xd0   : > { %v1167_v20 = vpop.xlane.xlu1 %241 }
  0xd1   : > { %v1169_v21 = vpop.xlane.xlu0 %225  ;;  %v333_v57 = vrot.slane %v1167_v20, %v280_v47 }
  0xd2   : > { %v281_v60 = vrot.slane %v1169_v21, %v280_v47 }
  0xd3   : > { %v334_v10 = vsel %vm282_vm1, %v333_v57, %v329_v0 }
  0xd4   : > { %v1171_v22 = vpop.xlane.xlu1 %374  ;;  %v283_v13 = vsel %vm282_vm1, %v281_v60, %v276_v6 }
  0xd5   : > { %v1173_v23 = vpop.xlane.xlu0 %372  ;;  %v427_v61 = vrot.slane %v1171_v22, %v280_v47 }
  0xd6   : > { %v423_v62 = vrot.slane %v1173_v23, %v275_v51 }
  0xd8   : > { %v1175_v24 = vpop.xlane.xlu1 %390  ;;  %v428_v14 = vsel %vm282_vm1, %v427_v61, %v423_v62 }
  0xd9   : > { %v1177_v25 = vpop.xlane.xlu0 %388  ;;  %v466_v1 = vrot.slane %v1175_v24, %v280_v47 }
  0xda   : > { %v462_v2 = vrot.slane %v1177_v25, %v275_v51 }
  0xdc   : > { %v1179_v26 = vpop.xlane.xlu1 %243  ;;  %v467_v17 = vsel %vm282_vm1, %v466_v1, %v462_v2  ;;  %v371_v2 = vld [vmem:[#allocation3] sm:$0x3] }
  0xdd   : > { %v1181_v27 = vpop.xlane.xlu0 %227  ;;  %v338_v3 = vrot.slane %v1179_v26, %v287_v52 }
  0xde   : > { %v288_v7 = vrot.slane %v1181_v27, %v287_v52 }
  0xdf   : > { %v339_v18 = vsel %vm289_vm2, %v338_v3, %v334_v10 }
  0xe0   : > { %v1183_v28 = vpop.xlane.xlu1 %392  ;;  %v290_v23 = vsel %vm289_vm2, %v288_v7, %v283_v13  ;;  %v515_v7 = vld [vmem:[%s1373_s1 + $0x8] sm:$0xff] (!%p767_p7) }
  0xe1   : > { %v1185_v29 = vpop.xlane.xlu0 %376  ;;  %v471_v8 = vrot.slane %v1183_v28, %v287_v52 }
  0xe2   : > { %v432_v9 = vrot.slane %v1185_v29, %v287_v52 }
  0xe3   : > { %v472_v24 = vsel %vm289_vm2, %v471_v8, %v467_v17  ;;  %v516_v8 = vld [vmem:[%s1373_s1 + $0x10] sm:$0xff] (!%p767_p7) }
  0xe4   : > { %v1187_v30 = vpop.xlane.xlu1 %245  ;;  %v433_v25 = vsel %vm289_vm2, %v432_v9, %v428_v14  ;;  %v1015_v9 = vmov (!%p767_p7), 0.0|0.0   ;;  %v518_v14 = vld [vmem:[%s1373_s1 + $0x20] sm:$0xff] (!%p767_p7)  ;;  %v520_v17 = vld [vmem:[%s1373_s1 + $0x30] sm:$0xff] (!%p767_p7) }
  0xe5   : > { %v1189_v31 = vpop.xlane.xlu0 %229  ;;  %v343_v11 = vrot.slane %v1187_v30, %v1211_v55  ;;  %811 = vmatprep.subr.bf16.mxu0 (!%p767_p7), %v1015_v9 }
  0xe6   : > { %v295_v12 = vrot.slane %v1189_v31, %v1211_v55 }
  0xe7   : > { %v344_v27 = vsel %vm296_vm3, %v343_v11, %v339_v18  ;;  %v517_v11 = vld [vmem:[%s1373_s1 + $0x18] sm:$0xff] (!%p767_p7) }
  0xe8   : > { %v1191_v32 = vpop.xlane.xlu1 %394  ;;  %v297_v28 = vsel %vm296_vm3, %v295_v12, %v290_v23  ;;  %v1017_v12 = vmov (!%p767_p7), 0.0   ;;  %v815_v13 = vpack.c.bf16 (!%p767_p7), %v517_v11, %v516_v8  ;;  %v521_v18 = vld [vmem:[%s1373_s1 + $0x38] sm:$0xff] (!%p767_p7) }
  0xe9   : > { %v1193_v33 = vpop.xlane.xlu0 %378  ;;  %v476_v15 = vrot.slane %v1191_v32, %v1211_v55  ;;  %803 = vmatprep.mubr.msk.f32.mxu0 (!%p767_p7), %vm1016_vm10, %v1017_v12  ;;  %806 = vmatprep.subr.mxu1 (!%p767_p7), %v1017_v12 }
  0xea   : > { %v437_v32 = vrot.slane %v1193_v33, %v1211_v55  ;;  %808 = vmatprep.mubr.msk.f32.mxu1 (!%p767_p7), %vm1016_vm10, %v1017_v12 }
  0xeb   : > { %v477_v31 = vsel %vm296_vm3, %v476_v15, %v472_v24  ;;  %v519_v15 = vld [vmem:[%s1373_s1 + $0x28] sm:$0xff] (!%p767_p7) }
  0xec   : > { %v1195_v35 = vpop.xlane.xlu1 %247  ;;  %v438_v50 = vsel %vm296_vm3, %v437_v32, %v433_v25  ;;  %v522_v25 = vld [vmem:[%s1374_s2] sm:$0xf] (!%p767_p7) }
  0xed   : > { %v1197_v36 = vpop.xlane.xlu0 %231  ;;  %v348_v16 = vrot.slane %v1195_v35, %v1213_v56  ;;  %807 = vmatpush3.msk.msra.mxu1 (!%p767_p7), %vm602_vm13, %v522_v25 }
  0xee   : > { %v302_v19 = vrot.slane %v1197_v36, %v1213_v56 }
  0xef   : > { %v349_v34 = vsel %vm303_vm4, %v348_v16, %v344_v27  ;;  %v818_v16 = vpack.c.bf16 (!%p767_p7), %v519_v15, %v518_v14 }
  0xf0   : > { %v1199_v38 = vpop.xlane.xlu1 %396  ;;  %v304_v36 = vsel %vm303_vm4, %v302_v19, %v297_v28 }
  0xf1   : > { %v1201_v39 = vpop.xlane.xlu0 %380  ;;  %v481_v35 = vrot.slane %v1199_v38, %v1213_v56 }
  0xf2   : > { %v442_v37 = vrot.slane %v1201_v39, %v1213_v56 }
  0xf3   : > { %v482_v51 = vsel %vm303_vm4, %v481_v35, %v477_v31 }
  0xf4   : > { %v1203_v43 = vpop.xlane.xlu1 %249 }
  0xf5   : > { %v1205_v44 = vpop.xlane.xlu0 %233  ;;  %v353_v20 = vrot.slane %v1203_v43, %v1216_v58 }
  0xf6   : > { %v309_v26 = vrot.slane %v1205_v44, %v1216_v58 }
  0xf7   : > { %v354_v40 = vsel %vm310_vm5, %v353_v20, %v349_v34 }
  0xf8   : > { %v1207_v53 = vpop.xlane.xlu1 %398  ;;  %v311_v44 = vsel %vm310_vm5, %v309_v26, %v304_v36 }
  0xf9   : > { %v1209_v54 = vpop.xlane.xlu0 %382  ;;  %v486_v41 = vrot.slane %v1207_v53, %v1216_v58 }
  0xfa   : > { %v447_v33 = vrot.slane %v1209_v54, %v1216_v58  ;;  %v443_v54 = vsel %vm303_vm4, %v442_v37, %v438_v50 }
  0xfb   : > { %v487_v55 = vsel %vm310_vm5, %v486_v41, %v482_v51 }
  0xfc   : > { %v252_v4 = vpop.xlane.xlu1 %251 }
  0xfd   : > { %v236_v5 = vpop.xlane.xlu0 %235  ;;  %v358_v29 = vrot.slane %v252_v4, %v1218_v59 }
  0xfe   : > { %v316_v30 = vrot.slane %v236_v5, %v1218_v59 }
  0xff   : > { %v359_v46 = vsel %vm317_vm6, %v358_v29, %v354_v40 }
 0x100   : > { %v401_v21 = vpop.xlane.xlu1 %400  ;;  %v318_v39 = vsel %vm317_vm6, %v316_v30, %v311_v44 }
 0x101   : > { %v385_v22 = vpop.xlane.xlu0 %384  ;;  %v491_v47 = vrot.slane %v401_v21, %v1218_v59  ;;  %v821_v21 = vpack.c.bf16 (!%p767_p7), %v521_v18, %v520_v17 }
 0x102   : > { %v452_v48 = vrot.slane %v385_v22, %v1218_v59  ;;  %v448_v59 = vsel %vm310_vm5, %v447_v33, %v443_v54 }
 0x103   : > { %v492_v0 = vsel %vm317_vm6, %v491_v47, %v487_v55 }
 0x104   : > { %v254_v42 = vpop.xlane.xlu1 %253  ;;  %v453_v1 = vsel %vm317_vm6, %v452_v48, %v448_v59 }
 0x105   : > { %v238_v43 = vpop.xlane.xlu0 %237  ;;  %v363_v45 = vrot.slane %v254_v42, %v1223_v63 }
 0x106   : > { %v323_v38 = vrot.slane %v238_v43, %v1223_v63 }
 0x107   : > { %v364_v52 = vsel %vm324_vm7, %v363_v45, %v359_v46 }
 0x108   : > { %v325_v53 = vsel %vm324_vm7, %v323_v38, %v318_v39  ;;  %v403_v57 = vpop.xlane.xlu1 %402 }
 0x109   : > { %v366_v56 = vsel %vm365_vm8, %v364_v52, %v325_v53  ;;  %v387_v58 = vpop.xlane.xlu0 %386  ;;  %v496_v61 = vrot.slane %v403_v57, %v1223_v63 }
 0x10a   : > { %v368_v60 = vadd.f32 %v366_v56, %v222_v49  ;;  %v457_v62 = vrot.slane %v387_v58, %v1223_v63  ;;  %505 = sbr.rel (%p767_p7) target bundleno = 741 (0x2e5), region = 44  ;;  %v514_v63 = vld [vmem:[%s1373_s1] sm:$0xff] (!%p767_p7) }
 0x10b   : > { %v497_v3 = vsel %vm324_vm7, %v496_v61, %v492_v0  ;;  %v812_v10 = vpack.c.bf16 (!%p767_p7), %v515_v7, %v514_v63 }
 0x10c   : > { %370 = vst.msk [vmem:[#allocation2] sm:$0x3] %vm369_vm9, %v368_v60  ;;  %v458_v4 = vsel %vm324_vm7, %v457_v62, %v453_v1 }
 0x10d   : > { %v498_v5 = vsel %vm365_vm8, %v497_v3, %v458_v4  ;;  %813 = vmatpush3.bf16.msra.mxu0 (!%p767_p7), %v812_v10 }
 0x10e   : > { %v500_v6 = vmax.f32 %v371_v2, %v498_v5  ;;  %814 = vmatprep.subr.bf16.mxu0 (!%p767_p7), %v1015_v9 }
 0x110   : > { %501 = vst.msk [vmem:[#allocation3] sm:$0x3] %vm369_vm9, %v500_v6 }
 0x111   : > { %816 = vmatpush3.bf16.msra.mxu0 %v815_v13 }
 0x112   : > { %817 = vmatprep.subr.bf16.mxu0 %v1015_v9 }
 0x113   : > { %v506_v19 = vld [vmem:[#allocation2] sm:$0x3] }
 0x114   : > { %v507_v22 = vmul.f32 0.00390625, %v506_v19 }
 0x115   : > { %819 = vmatpush3.bf16.msra.mxu0 %v818_v16 }
 0x116   : > { %820 = vmatprep.subr.bf16.mxu0 %v1015_v9 }
 0x117   : > { %v508_v20 = vld [vmem:[#allocation3] sm:$0x3] }
 0x118   : > { %v510_v23 = vrot.slane %v508_v20, 6 }
 0x119   : > { %822 = vmatpush3.bf16.msra.mxu0 %v821_v21 }
 0x11a   : > { %v513_v24 = vsel %vm512_vm11, %v507_v22, %v510_v23 }
 0x11c   : > { %804 = vmatmul.mubr.msk.f32.vlgmr.msra.gmra.mrb[0].mxu0 %vm523_vm12, %v513_v24 }
 0x1ef   : > { %v593_v26 = vpop.f32.mrb[0].mxu0 }
 0x1f0   : > { %v597_v27 = vmax.f32 %v593_v26, 0.0  ;;  %v805_v28 = vpop.f32.mrb[1].mxu0 }
 0x1f2   : > { %809 = vmatmul.mubr.msk.f32.vlgmr.msra.gmra.mrb[0].mxu1 %vm598_vm14, %v597_v27 }
 0x2c5   : > { %v672_v29 = vpop.f32.mrb[0].mxu1 }
 0x2c6   : > { %v677_v30 = vrot.slane %v672_v29, 2  ;;  %v810_v31 = vpop.f32.mrb[1].mxu1 }
 0x2c8   : > { %v679_v32 = vadd.f32 %v677_v30, %v672_v29 }
 0x2ca   : > { %v771_v34 = vmul.f32 -1.442695, %v679_v32 }
 0x2cc   : > { %893 = vpow2.f32 %v771_v34 }
 0x2d6   : > { %v894_v35 = vpop.eup %893 }
 0x2d7   : > { %v683_v36 = vadd.f32 1.0, %v894_v35 }
 0x2d9   : > { %895 = vrcp.f32 %v683_v36 }
 0x2e3   : > { %v896_v37 = vpop.eup %895 }
 0x2e4   : > { %686 = vst.msk [vmem:[#allocation7] sm:$0x3] %vm369_vm9, %v896_v37 }
 0x2e5 PF: > { %p1328_p9 = scmp.eq.s32.totalorder %s759_s18, 1  ;;  %s1018_s10 = smov [#allocation7]  }
 0x2e6   : > { %s696_s23 = sshll.u32 %s1018_s10, 4  ;;  %s697_s23 = int_to_ptr.vmem [resolvable:$true] %s696_s23 }
 0x2e7   : > { %s927_s30 = scalar_lea.vmem %s697_s23, 32  ;;  %p934_p11 = scmp.lt.s32.totalorder %s697_s23, %s697_s23 }
 0x2e8   : > { %p928_p5 = scmp.ne.s32.totalorder %s697_s23, %s927_s30  ;;  %p935_p13 = scmp.lt.s32.totalorder %s927_s30, %s927_s30 }
 0x2ea   : > { %p929_p6 = pnand %p928_p5, %p1328_p9  ;;  %p936_p1 = por %p935_p13, %p934_p11 }
 0x2ec   : > { %p930_p8 = pneg %p929_p6 }
 0x2ee   : > { %p937_p2 = pnand %p936_p1, %p930_p8 }
 0x2f0   : > { %940 = shalt.err (!%p937_p2)
}
 0x2f1   : > { %s941_s18 = scalar_lea.hbm %s1375_s3, 32 }
 0x2f2   : > { %p942_p3 = scmp.ne.s32.totalorder %s1375_s3, %s941_s18  ;;  %p947_p4 = scmp.lt.u32.totalorder %s941_s18, %s1375_s3 }
 0x2f4   : > { %p943_p12 = pnand %p942_p3, %p1328_p9 }
 0x2f6   : > { %p944_p0 = pneg %p943_p12 }
 0x2f8   : > { %p949_p10 = pnand %p947_p4, %p944_p0 }
 0x2fa   : > { %952 = shalt.err (!%p949_p10)
}
 0x2fb   : > { %826 = dma.vmem_to_hbm [thread:$0]  (%p1328_p9), %s697_s23, 32, %s1375_s3, [#allocation6]  }
 0x2fc   : > { %982 = dma.done.wait (%p1328_p9), [#allocation6], 32  }
 0x2fd   : > { %984 = vsyncadd (%p1328_p9), [#allocation6], 4294967264 }
 0x2fe PF: > { %s17_s17 = sadd.s32 1, %s1007_s17   ;;  %s1381_s12 = smov %s991_s13 }
 0x2ff   : > { %p14_p7 = scmp.ge.s32.totalorder %s17_s17, 4   ;;  %s1382_s13 = smov %s995_s14 }
 0x300   : > { %s1383_s14 = smov %s1090_s24  ;;  %s1384_s15 = smov %s1003_s16 }
 0x301   : > { %s1385_s16 = smov %s1387_s19  ;;  %16 = sbr.rel (!%p14_p7) target bundleno = 5 (0x5), region = 78 }
 0x308   :  { %709 = vsyncpa [#allocation5], 1 }
 0x309   :  { %711 = vsyncpa [#allocation5 + $0x1], 1 }
 0x30a   :  { %712 = vsyncpa [#allocation6], 1 }
 0x30b   :  { %714 = vsyncpa [#allocation6 + $0x1], 1 }

</bundles_post_ra>
